<compile_context>
chip_gen: v7x
topology: tpu7x:2x2x1
jax: 0.10.0
libtpu: 0.0.40
codegen_flags: <defaults>
</compile_context>

<pallas_src>
import functools

import numpy as np
import jax
import jax.numpy as jnp
from jax import lax
from jax.experimental import pallas as pl
from jax.experimental.pallas import tpu as pltpu

LL_LEN = 17
PK_LEN = 40
EMBED = 128
CPAD = 128             # lane width used for every conv stage
K1, K2, K3 = 4, 6, 8   # Conv1d kernel sizes of the stack
BATCH_TILE = 16        # max batch elements per grid step


def _prelu(x, a):
    return jnp.where(x > 0, x, a * x)


def _conv_stack_out_len(L):
    """Valid length after conv(4) -> pool(2) -> conv(6) -> pool(2) -> conv(8)."""
    L1 = L - K1 + 1
    L2 = L1 // 2 - K2 + 1
    L3 = L2 // 2 - K3 + 1
    if L3 < 1:
        raise ValueError(f"sequence length {L} too short for the conv stack")
    return L3


# ----------------------------------------------------------------------------
# Runtime probes (resolved once, cached).
# ----------------------------------------------------------------------------
def _roll_probe_kernel(x_ref, o_ref):
    o_ref[0] = pltpu.roll(x_ref[...], 1, axis=0)
    o_ref[1] = pltpu.roll(x_ref[...], 1, axis=1)


@functools.lru_cache(maxsize=None)
def _roll_conventions():
    """Returns (sublane_is_numpy, lane_is_numpy) for pltpu.roll."""
    x = (jnp.arange(8, dtype=jnp.float32)[:, None] * 128.0
         + jnp.arange(128, dtype=jnp.float32)[None, :])
    out = np.asarray(jax.device_get(pl.pallas_call(
        _roll_probe_kernel,
        out_shape=jax.ShapeDtypeStruct((2, 8, 128), jnp.float32))(x)))
    return bool(out[0, 1, 0] == 0.0), bool(out[1, 0, 1] == 0.0)


def _stride_probe_kernel(x_ref, o_ref, s_ref):
    s_ref[...] = x_ref[...]
    o_ref[pl.ds(0, 8), :] = s_ref[pl.ds(0, 8, stride=2), :]
    o_ref[pl.ds(8, 4), :] = s_ref[pl.ds(0, 4, stride=10), :]


@functools.lru_cache(maxsize=None)
def _strided_reload_supported():
    """True iff sublane-strided reloads from a VMEM scratch lower and are correct."""
    try:
        x = jnp.broadcast_to(jnp.arange(40, dtype=jnp.float32)[:, None], (40, 128))
        out = np.asarray(jax.device_get(pl.pallas_call(
            _stride_probe_kernel,
            out_shape=jax.ShapeDtypeStruct((12, 128), jnp.float32),
            scratch_shapes=[pltpu.VMEM((40, 128), jnp.float32)])(x)))
        ok = (np.array_equal(out[:8, 0], np.arange(0, 16, 2, dtype=np.float32))
              and np.array_equal(out[8:, 0], np.arange(0, 40, 10, dtype=np.float32)))
        return bool(ok)
    except Exception:
        return False


# ----------------------------------------------------------------------------
# Fused kernel
# ----------------------------------------------------------------------------
def _branch(x_ref, we, be, w1, b1, w2, b2, w3, b3, a_ref, stage,
            *, seq, true_len, np_sub, np_lane, compact):
    """Linear embed + conv stack for one batch tile.  x_ref: (TB*seq, F).

    Returns (TB, 128) f32 features (the AdaptiveMaxPool1d(1) output).
    """
    f32, bf16 = jnp.float32, jnp.bfloat16
    M = x_ref.shape[0]
    tb = M // seq

    L1 = true_len - K1 + 1
    P1 = L1 // 2
    L2 = P1 - K2 + 1
    P2 = L2 // 2
    L3 = P2 - K3 + 1

    def rroll(h, s):            # out[j] = h[(j + s) % n]   (read s rows below)
        n = h.shape[0]
        return pltpu.roll(h, (n - s) % n if np_sub else s, axis=0)

    def lshift(h, s):           # data at lane l moves to lane l + s
        return pltpu.roll(h, s if np_lane else (CPAD - s), axis=1)

    def conv(h, w_ref, b_ref, alpha, ksz, cin_eff, tap_stride):
        """h: (m,128) f32 with real channels in lanes [0,cin_eff), zeros elsewhere.
        The k taps (row shifts of `tap_stride`) x cin_eff channels are packed
        densely into 128-lane blocks (XLU lane rolls + adds over disjoint
        supports) and contracted as K<=256 bf16 matmuls with f32 accumulation."""
        tpb = CPAD // cin_eff                     # taps packed per 128-lane block
        nblk = -(-ksz // tpb)
        blocks = []
        for blk in range(nblk):
            acc = None
            for s in range(tpb):
                tap = blk * tpb + s
                if tap >= ksz:
                    break
                v = rroll(h, tap * tap_stride) if tap else h
                if s:
                    v = lshift(v, s * cin_eff)
                acc = v if acc is None else acc + v
            blocks.append(acc.astype(bf16))
        out = None
        for g in range(0, nblk, 2):
            grp = blocks[g:g + 2]
            xg = grp[0] if len(grp) == 1 else jnp.concatenate(grp, axis=1)
            wg = w_ref[g * CPAD:(g + len(grp)) * CPAD, :]
            d = jnp.dot(xg, wg, preferred_element_type=f32)
            out = d if out is None else out + d
        return _prelu(out + b_ref[...], alpha)

    # Embedding (Linear LL_LEN/PK_LEN -> 128), bf16 operands, f32 accumulate.
    e = (jnp.dot(x_ref[...].astype(bf16), we[...], preferred_element_type=f32)
         + be[...])                                          # (M, 128) f32

    if compact:
        def pool_compact(h):
            # MaxPool1d(2): pair max lands at even rows, then a stride-2 reload
            # through the VMEM scratch drops the odd rows (row count halves).
            m = h.shape[0]
            pooled = jnp.maximum(h, rroll(h, 1))
            stage[pl.ds(0, m), :] = pooled
            return stage[pl.ds(0, m // 2, stride=2), :]

        c1 = conv(e, w1, b1, a_ref[0], K1, 128, 1)      # valid rows t < L1
        m1 = pool_compact(c1)                           # (M/2,128), valid p < P1
        c2 = conv(m1, w2, b2, a_ref[1], K2, 32, 1)      # valid t < L2
        m2 = pool_compact(c2)                           # (M/4,128), valid p < P2
        c3 = conv(m2, w3, b3, a_ref[2], K3, 64, 1)      # valid t < L3

        # AdaptiveMaxPool1d(1): window-max over the L3 valid rows, then gather
        # one row per sample with a single strided reload (no iota mask).
        seq3 = seq // 4
        amax = c3
        for t in range(1, L3):
            amax = jnp.maximum(amax, rroll(c3, t))
        n3 = c3.shape[0]
        stage[pl.ds(0, n3), :] = amax
        return stage[pl.ds(0, tb, stride=seq3), :]      # (tb, 128)

    # Fallback: pooled values stay in place at row stride 2**stage; the next
    # conv reads its taps at that stride (original validated scheme + packing).
    c1 = conv(e, w1, b1, a_ref[0], K1, 128, 1)
    m1 = jnp.maximum(c1, rroll(c1, 1))
    c2 = conv(m1, w2, b2, a_ref[1], K2, 32, 2)
    m2 = jnp.maximum(c2, rroll(c2, 2))
    c3 = conv(m2, w3, b3, a_ref[2], K3, 64, 4)
    c3 = c3.reshape(tb, seq, CPAD)
    row = lax.broadcasted_iota(jnp.int32, (tb, seq, CPAD), 1)
    valid = jnp.logical_and(row % 4 == 0, row < 4 * L3)
    return jnp.max(jnp.where(valid, c3, -jnp.inf), axis=1)


def _fused_kernel(ll_ref, pk_ref,
                  we_l, be_l, w1_l, b1_l, w2_l, b2_l, w3_l, b3_l,
                  we_p, be_p, w1_p, b1_p, w2_p, b2_p, w3_p, b3_p,
                  wo_ref, cw1_ref, cb1_ref, cw2_ref, cb2_ref, cw3_ref, cb3_ref,
                  a_ll_ref, a_pk_ref, a_cls_ref,
                  out_ref, stage_ref,
                  *, seq_ll, len_ll, seq_pk, len_pk, np_sub, np_lane, compact):
    f32, bf16 = jnp.float32, jnp.bfloat16
    common = dict(np_sub=np_sub, np_lane=np_lane, compact=compact)
    ll_feat = _branch(ll_ref, we_l, be_l, w1_l, b1_l, w2_l, b2_l, w3_l, b3_l,
                      a_ll_ref, stage_ref, seq=seq_ll, true_len=len_ll, **common)
    pk_feat = _branch(pk_ref, we_p, be_p, w1_p, b1_p, w2_p, b2_p, w3_p, b3_p,
                      a_pk_ref, stage_ref, seq=seq_pk, true_len=len_pk, **common)
    x = jnp.concatenate([pk_feat, ll_feat], axis=1)          # (tb, 256), pk first

    # attention_net on a length-1 sequence: q == k == v == tanh(x @ w_omega),
    # scores is (., 1, 1) so softmax == 1 and context == q.  (Only valid because
    # the torch model reshapes the concat to sequence length 1.)
    h = x + jnp.tanh(jnp.dot(x.astype(bf16), wo_ref[...],
                             preferred_element_type=f32))

    # TODO(synk): nn.Dropout(0.2) implemented as identity (inference-only kernel).
    h = _prelu(jnp.dot(h.astype(bf16), cw1_ref[...], preferred_element_type=f32)
               + cb1_ref[...], a_cls_ref[0])
    h = _prelu(jnp.dot(h.astype(bf16), cw2_ref[...], preferred_element_type=f32)
               + cb2_ref[...], a_cls_ref[1])
    # Final 128 -> 1 layer on the VPU/XLU (an N=1 MXU matmul wastes 127/128 cols).
    y = jnp.sum(h * cw3_ref[...], axis=1, keepdims=True) + cb3_ref[...]
    out_ref[...] = y.reshape(out_ref.shape)


# ----------------------------------------------------------------------------
# Parameter init (raw, PyTorch-default-style) + kernel-ready packing.
# ----------------------------------------------------------------------------
def init_params(key):
    def uni(k, shape, bound):
        return jax.random.uniform(k, shape, jnp.float32, -bound, bound)

    def linear(k, fin, fout):
        bound = 1.0 / np.sqrt(fin)
        k1, k2 = jax.random.split(k)
        return uni(k1, (fin, fout), bound), uni(k2, (fout,), bound)

    def conv(k, cin, cout, ksz):
        # torch Conv1d weight (cout, cin, k) stored transposed as (k, cin, cout).
        bound = 1.0 / np.sqrt(cin * ksz)
        k1, k2 = jax.random.split(k)
        return uni(k1, (ksz, cin, cout), bound), uni(k2, (cout,), bound)

    def branch(k, fin):
        k0, kc1, kc2, kc3 = jax.random.split(k, 4)
        we, be = linear(k0, fin, EMBED)
        w1, b1 = conv(kc1, EMBED, 32, K1)
        w2, b2 = conv(kc2, 32, 64, K2)
        w3, b3 = conv(kc3, 64, 128, K3)
        return dict(we=we, be=be, w1=w1, b1=b1, w2=w2, b2=b2, w3=w3, b3=b3,
                    alpha=jnp.full((3,), 0.25, jnp.float32))     # nn.PReLU default

    kll, kpk, kw, kc1, kc2, kc3 = jax.random.split(key, 6)
    cw1, cb1 = linear(kc1, 256, 128)
    cw2, cb2 = linear(kc2, 128, 32)
    cw3, cb3 = linear(kc3, 32, 1)
    return {
        "ll": branch(kll, LL_LEN),
        "pk": branch(kpk, PK_LEN),
        "w_omega": uni(kw, (256, 256), 0.1),                     # uniform_(-0.1, 0.1)
        "cls": dict(w1=cw1, b1=cb1, w2=cw2, b2=cb2, w3=cw3, b3=cb3,
                    alpha=jnp.full((2,), 0.25, jnp.float32)),
    }


def _pack_params(p):
    """Raw params -> kernel operands: bf16 weights, taps x cin packed densely
    into 128-lane blocks of the contraction dim, biases padded to 128 lanes."""
    bf16, f32 = jnp.bfloat16, jnp.float32

    def pack_conv(w, b):
        ksz, cin, cout = w.shape
        assert CPAD % cin == 0
        tpb = CPAD // cin
        nblk = -(-ksz // tpb)
        wp = jnp.zeros((nblk * CPAD, CPAD), f32)
        for tap in range(ksz):
            blk, s = divmod(tap, tpb)
            r0 = blk * CPAD + s * cin
            wp = wp.at[r0:r0 + cin, :cout].set(w[tap])
        bp = jnp.zeros((1, CPAD), f32).at[0, :cout].set(b)
        return wp.astype(bf16), bp

    def branch(bp):
        we = bp["we"].astype(bf16)
        be = bp["be"].reshape(1, -1).astype(f32)
        w1, b1 = pack_conv(bp["w1"], bp["b1"])
        w2, b2 = pack_conv(bp["w2"], bp["b2"])
        w3, b3 = pack_conv(bp["w3"], bp["b3"])
        return [we, be, w1, b1, w2, b2, w3, b3]

    c = p["cls"]
    cw2 = jnp.zeros((128, CPAD), f32).at[:, :32].set(c["w2"]).astype(bf16)
    cb2 = jnp.zeros((1, CPAD), f32).at[0, :32].set(c["b2"])
    cw3 = jnp.zeros((1, CPAD), f32).at[0, :32].set(c["w3"][:, 0])
    cb3 = c["b3"].reshape(1, 1).astype(f32)
    vmem = (branch(p["ll"]) + branch(p["pk"])
            + [p["w_omega"].astype(bf16),
               c["w1"].astype(bf16), c["b1"].reshape(1, -1).astype(f32),
               cw2, cb2, cw3, cb3])
    smem = [p["ll"]["alpha"], p["pk"]["alpha"], c["alpha"]]
    return vmem, smem


# ----------------------------------------------------------------------------
# Wrapper
# ----------------------------------------------------------------------------
def model1_forward(ll, pk, params, batch_tile=BATCH_TILE):
    """ll: (B, L_ll, 17), pk: (B, L_pk, 40)  ->  (B, 1) float32 (inference)."""
    B, l_ll, f_ll = ll.shape
    Bp, l_pk, f_pk = pk.shape
    assert B == Bp and f_ll == LL_LEN and f_pk == PK_LEN
    out_ll = _conv_stack_out_len(l_ll)
    out_pk = _conv_stack_out_len(l_pk)

    # Batch tile: big enough to amortise per-step overhead, but keep >= 2 grid
    # steps when B >= 2 so both v7x TensorCores get work.
    tb = max(1, min(batch_tile, -(-B // 2)))
    n_steps = -(-B // tb)
    b_pad = n_steps * tb
    sl_ll = -(-l_ll // 8) * 8          # pad seq to a sublane multiple
    sl_pk = -(-l_pk // 8) * 8

    # Static invariants of the roll / compaction scheme: every tap read feeding
    # a *valid* output row stays inside its own sample at every stage.
    for L, sl, lout in ((l_ll, sl_ll, out_ll), (l_pk, sl_pk, out_pk)):
        L1 = L - K1 + 1
        P1 = L1 // 2
        L2 = P1 - K2 + 1
        P2 = L2 // 2
        L3 = P2 - K3 + 1
        assert L3 == lout and min(L1, L2, L3) >= 1
        assert sl % 8 == 0 and sl >= L
        assert (L1 - 1) + (K1 - 1) <= L - 1
        assert (L2 - 1) + (K2 - 1) <= P1 - 1
        assert (L3 - 1) + (K3 - 1) <= P2 - 1
        assert L3 <= sl // 4

    def prep_x(x, l_pad):
        b, l, f = x.shape
        x = jnp.pad(x.astype(jnp.float32),
                    ((0, b_pad - b), (0, l_pad - l), (0, 0)))
        return x.reshape(b_pad * l_pad, f)

    ll2 = prep_x(ll, sl_ll)
    pk2 = prep_x(pk, sl_pk)

    vmem_args, smem_args = _pack_params(params)

    def const_spec(a):
        nd = a.ndim
        return pl.BlockSpec(a.shape, lambda b, _nd=nd: (0,) * _nd)

    smem_spec = pl.BlockSpec(memory_space=pltpu.MemorySpace.SMEM)

    np_sub, np_lane = _roll_conventions()
    compact = _strided_reload_supported()

    grid_spec = pltpu.PrefetchScalarGridSpec(
        num_scalar_prefetch=0,
        grid=(n_steps,),
        in_specs=[
            pl.BlockSpec((tb * sl_ll, f_ll), lambda b: (b, 0)),
            pl.BlockSpec((tb * sl_pk, f_pk), lambda b: (b, 0)),
            *[const_spec(a) for a in vmem_args],
            smem_spec, smem_spec, smem_spec,
        ],
        out_specs=pl.BlockSpec((1, tb, 1), lambda b: (b, 0, 0)),
        scratch_shapes=[pltpu.VMEM((tb * max(sl_ll, sl_pk), CPAD), jnp.float32)],
    )

    kernel = functools.partial(
        _fused_kernel, seq_ll=sl_ll, len_ll=l_ll, seq_pk=sl_pk, len_pk=l_pk,
        np_sub=np_sub, np_lane=np_lane, compact=compact)

    out = pl.pallas_call(
        kernel,
        out_shape=jax.ShapeDtypeStruct((n_steps, tb, 1), jnp.float32),
        grid_spec=grid_spec,
        compiler_params=pltpu.CompilerParams(
            dimension_semantics=("parallel",),
            vmem_limit_bytes=48 * 1024 * 1024),
    )(ll2, pk2, *vmem_args, *smem_args)
    return out.reshape(b_pad, 1)[:B]


# ----------------------------------------------------------------------------
# Plain-JAX reference with matching numerics (bf16 matmul operands, f32 accum).
# ----------------------------------------------------------------------------
def _reference_forward(ll, pk, params):
    f32, bf16 = jnp.float32, jnp.bfloat16

    def bdot(a, b):
        return jnp.dot(a.astype(bf16), b.astype(bf16), preferred_element_type=f32)

    def branch(x, p):
        e = bdot(x.astype(f32), p["we"]) + p["be"]                 # (B, L, 128)

        def conv(h, w, b, alpha):
            ksz = w.shape[0]
            lo = h.shape[1] - ksz + 1
            c = b + sum(bdot(h[:, i:i + lo, :], w[i]) for i in range(ksz))
            return _prelu(c, alpha)

        def pool(h):
            lo = h.shape[1] // 2
            return jnp.max(h[:, :2 * lo].reshape(h.shape[0], lo, 2, -1), axis=2)

        c1 = conv(e, p["w1"], p["b1"], p["alpha"][0])
        c2 = conv(pool(c1), p["w2"], p["b2"], p["alpha"][1])
        c3 = conv(pool(c2), p["w3"], p["b3"], p["alpha"][2])
        return jnp.max(c3, axis=1)                                 # (B, 128)

    pkf = branch(pk, params["pk"])
    llf = branch(ll, params["ll"])
    x = jnp.concatenate([pkf, llf], axis=1)                        # (B, 256)

    # attention_net with the full scaled-dot-product path (sequence length 1).
    q = jnp.tanh(bdot(x, params["w_omega"]))[:, None, :]
    scores = jnp.matmul(q, jnp.swapaxes(q, -1, -2),
                        precision=lax.Precision.HIGHEST) / jnp.sqrt(256.0)
    ctx = jnp.matmul(jax.nn.softmax(scores, axis=-1), q,
                     precision=lax.Precision.HIGHEST)[:, 0, :]
    h = x + ctx

    c = params["cls"]
    h = _prelu(bdot(h, c["w1"]) + c["b1"], c["alpha"][0])
    h = _prelu(bdot(h, c["w2"]) + c["b2"], c["alpha"][1])
    return jnp.dot(h, c["w3"], precision=lax.Precision.HIGHEST) + c["b3"]


if __name__ == "__main__":
    key = jax.random.PRNGKey(0)
    kll, kpk, kp = jax.random.split(key, 3)
    B = 3   # odd batch: exercises batch padding, multi-sample tiles, 2 grid steps
    ll = jax.random.normal(kll, (B, 64, LL_LEN), jnp.float32)   # (B, L_ll, 17)
    pk = jax.random.normal(kpk, (B, 80, PK_LEN), jnp.float32)   # (B, L_pk, 40)
    params = init_params(kp)

    out = jax.block_until_ready(model1_forward(ll, pk, params))
    assert out.shape == (B, 1) and out.dtype == jnp.float32

    ref = jax.block_until_ready(_reference_forward(ll, pk, params))
    np.testing.assert_allclose(np.asarray(out), np.asarray(ref), rtol=2e-2, atol=2e-2)
    print("KERNEL_OK")
</pallas_src>

<mosaic_0001>
module attributes {stable_mosaic.version = 11 : i64} {
  func.func @_roll_probe_kernel(%arg0: memref<8x128xf32, #tpu.memory_space<vmem>>, %arg1: memref<2x8x128xf32, #tpu.memory_space<vmem>>) attributes {dimension_semantics = [], scalar_prefetch = 0 : i64, scratch_operands = 0 : i64, tpu.core_type = #tpu.core_type<tc>} {
    %c0 = arith.constant 0 : index
    %c0_0 = arith.constant 0 : index
    %0 = vector.load %arg0[%c0, %c0_0] : memref<8x128xf32, #tpu.memory_space<vmem>>, vector<8x128xf32>
    %c1_i32 = arith.constant 1 : i32
    %1 = tpu.dynamic_rotate %0 by %c1_i32 dim 0 : vector<8x128xf32>, i32 -> vector<8x128xf32>
    %c0_1 = arith.constant 0 : index
    %c0_2 = arith.constant 0 : index
    %c0_3 = arith.constant 0 : index
    %2 = vector.load %arg1[%c0_1, %c0_2, %c0_3] : memref<2x8x128xf32, #tpu.memory_space<vmem>>, vector<1x8x128xf32>
    %3 = vector.shape_cast %2 : vector<1x8x128xf32> to vector<8x128xf32>
    %4 = vector.shape_cast %1 : vector<8x128xf32> to vector<1x8x128xf32>
    tpu.vector_store %arg1[%c0_1, %c0_2, %c0_3], %4 {strides = array<i32>} : memref<2x8x128xf32, #tpu.memory_space<vmem>>, vector<1x8x128xf32>,
    %c0_4 = arith.constant 0 : index
    %c0_5 = arith.constant 0 : index
    %5 = vector.load %arg0[%c0_4, %c0_5] : memref<8x128xf32, #tpu.memory_space<vmem>>, vector<8x128xf32>
    %c1_i32_6 = arith.constant 1 : i32
    %6 = tpu.dynamic_rotate %5 by %c1_i32_6 dim 1 : vector<8x128xf32>, i32 -> vector<8x128xf32>
    %c1 = arith.constant 1 : index
    %c0_7 = arith.constant 0 : index
    %c0_8 = arith.constant 0 : index
    %7 = vector.load %arg1[%c1, %c0_7, %c0_8] : memref<2x8x128xf32, #tpu.memory_space<vmem>>, vector<1x8x128xf32>
    %8 = vector.shape_cast %7 : vector<1x8x128xf32> to vector<8x128xf32>
    %9 = vector.shape_cast %6 : vector<8x128xf32> to vector<1x8x128xf32>
    tpu.vector_store %arg1[%c1, %c0_7, %c0_8], %9 {strides = array<i32>} : memref<2x8x128xf32, #tpu.memory_space<vmem>>, vector<1x8x128xf32>,
    return
  }
}

</mosaic_0001>

<bundles_post_ra>
// kernel: tpu_custom_call.1
= control target key start
LH: loop header
LB: loop body
LE: loop exit
PB: predicated region body
PF: predicated region fallthrough
CT: control target
= control target key end

     0   :  { %6 = vsyncpa [#allocation3], 0  ;;  %s138_s0 = inlined_call_operand.hbm [shape: f32[8,128], index: 0, kind: input, shape index: {}]   ;;  %s139_s1 = inlined_call_operand.hbm [shape: f32[2,8,128], index: 1, kind: output, shape index: {}]  }
   0x1   :  { %7 = vsyncpa [#allocation4], 0  ;;  %s99_s6 = smov [#allocation2]   ;;  %s51_s10 = scalar_lea.hbm %s138_s0, 128 }
   0x2   :  { %s14_s7 = sshll.u32 %s99_s6, 4  ;;  %p52_p0 = scmp.ne.s32.totalorder %s138_s0, %s51_s10  ;;  %s15_s7 = int_to_ptr.vmem [resolvable:$true] %s14_s7 }
   0x3   :  { %p55_p1 = scmp.lt.u32.totalorder %s51_s10, %s138_s0 }
   0x5   :  { %p57_p2 = pnand %p55_p1, %p52_p0 }
   0x7   :  { %60 = shalt.err (!%p57_p2)
}
   0x8   :  { %s61_s15 = scalar_lea.vmem %s15_s7, 128  ;;  %p66_p4 = scmp.lt.s32.totalorder %s15_s7, %s15_s7 }
   0x9   :  { %p62_p3 = scmp.ne.s32.totalorder %s15_s7, %s61_s15  ;;  %p67_p5 = scmp.lt.s32.totalorder %s61_s15, %s61_s15 }
   0xb   :  { %p68_p6 = por %p67_p5, %p66_p4 }
   0xd   :  { %p69_p7 = pnand %p68_p6, %p62_p3 }
   0xf   :  { %72 = shalt.err (!%p69_p7)
}
  0x10   :  { %17 = dma.hbm_to_vmem [thread:$0]  %s138_s0, 128, %s15_s7, [#allocation3]  }
  0x11   :  { %95 = dma.done.wait [#allocation3], 128  }
  0x12   :  { %96 = vsyncadd [#allocation3], 4294967168  ;;  %v21_v0 = vld [vmem:[#allocation2] sm:$0xff]  ;;  %s100_s18 = smov 1   ;;  %s101_s19 = smov [#allocation5]  }
  0x13   :  { %v22_v1 = vrot.slane %v21_v0, 7  ;;  %25 = vrot.lane.b32.xlu0 %v21_v0, %s100_s18  ;;  %s34_s20 = sshll.u32 %s101_s19, 4  ;;  %s35_s20 = int_to_ptr.vmem [resolvable:$true] %s34_s20 }
  0x14   :  { %s73_s21 = scalar_lea.vmem %s35_s20, 256  ;;  %p78_p9 = scmp.lt.s32.totalorder %s35_s20, %s35_s20 }
  0x15   :  { %23 = vst [vmem:[#allocation5] sm:$0xff] %v22_v1  ;;  %p74_p8 = scmp.ne.s32.totalorder %s35_s20, %s73_s21  ;;  %p79_p10 = scmp.lt.s32.totalorder %s73_s21, %s73_s21 }
  0x17   :  { %p80_p11 = por %p79_p10, %p78_p9 }
  0x19   :  { %p81_p12 = pnand %p80_p11, %p74_p8 }
  0x85   :  { %v26_v2 = vpop.permute.xlu0 %25 }
  0x86   :  { %28 = vst [vmem:[#allocation5 + $0x8] sm:$0xff] %v26_v2 }
  0x87   :  { %84 = shalt.err (!%p81_p12)
}
  0x88   :  { %s85_s23 = scalar_lea.hbm %s139_s1, 256 }
  0x89   :  { %p86_p13 = scmp.ne.s32.totalorder %s139_s1, %s85_s23  ;;  %p89_p0 = scmp.lt.u32.totalorder %s85_s23, %s139_s1 }
  0x8b   :  { %p91_p1 = pnand %p89_p0, %p86_p13 }
  0x8d   :  { %94 = shalt.err (!%p91_p1)
}
  0x8e   :  { %s102_s28 = smov 128   ;;  %s103_s29 = smov 8  }
  0x8f   :  { %40 = dma.vmem_to_hbm [thread:$0]  %s35_s20, 256, %s139_s1, [#allocation4], %s102_s28, %s102_s28, %s103_s29  }
  0x90   :  { %97 = dma.done.wait [#allocation4], 256  }
  0x91   :  { %98 = vsyncadd [#allocation4], 4294967040 }
  0x92   :  { %44 = vsyncpa [#allocation3], 1 }
  0x93   :  { %45 = vsyncpa [#allocation4], 1 }

</bundles_post_ra>
